<compile_context>
chip_gen: v7x
topology: tpu7x:2x2x1
jax: 0.10.0
libtpu: 0.0.40
codegen_flags: <defaults>
</compile_context>

<pallas_src>
import functools

import jax
import jax.numpy as jnp
from jax.experimental import pallas as pl
from jax.experimental.pallas import tpu as pltpu


def conv3d_leakyrelu_kernel(negative_slope, x_ref, w_ref, b_ref, o_ref):
    """One (batch, spatial-tile) block of the fused im2col conv.

    x_ref : (K, tM)     im2col patches, K = Cin*27, tM spatial columns (lanes)
    w_ref : (Cout, K)   reshaped conv weights
    b_ref : (Cout, 1)
    o_ref : (Cout, tM)  lane-dense output slab (channels-major)
    """
    y = jnp.dot(w_ref[...], x_ref[...], preferred_element_type=jnp.float32)
    y = y + b_ref[...]
    y = jnp.where(y >= 0, y, negative_slope * y)   # LeakyReLU(0.2)
    o_ref[...] = y.astype(o_ref.dtype)


def conv_block_forward(x, weight, bias, *, stride=1, negative_slope=0.2,
                       tile_m=256):
    """conv_block forward: Conv3d(k=3, stride=1, pad=1) + LeakyReLU(0.2).

    x      : (B, Cin, D, H, W)   NCDHW (PyTorch layout)
    weight : (Cout, Cin, 3, 3, 3)
    bias   : (Cout,)
    returns (B, Cout, D, H, W)
    """
    if stride != 1:
        # TODO(synk): stride=2 / ksize=4 variant of conv_block not implemented.
        raise NotImplementedError("Only the stride=1 (ksize=3, pad=1) path is implemented.")

    B, Cin, D, H, W = x.shape
    Cout, _, KD, KH, KW = weight.shape
    pad = 1

    # ---- wrapper-side layout plumbing (all XLA ops, nothing in-kernel) ----
    x_pad = jnp.pad(x, ((0, 0), (0, 0), (pad, pad), (pad, pad), (pad, pad)))
    # im2col: stack the 27 shifted windows; K axis ordering = (cin, kd, kh, kw)
    # so it matches weight.reshape(Cout, Cin*KD*KH*KW).
    patches = jnp.stack(
        [x_pad[:, :, kd:kd + D, kh:kh + H, kw:kw + W]
         for kd in range(KD) for kh in range(KH) for kw in range(KW)],
        axis=2)                                       # (B, Cin, 27, D, H, W)
    M = D * H * W
    K = Cin * KD * KH * KW
    patches = patches.reshape(B, K, M)                # lane-dense last dim
    w_mat = weight.reshape(Cout, K).astype(jnp.float32)
    b_mat = bias.reshape(Cout, 1).astype(jnp.float32)

    # Spatial tile (lane axis). Must divide M and be a multiple of 128.
    if M % tile_m != 0 or tile_m % 128 != 0:
        tile_m = M
    m_tiles = M // tile_m

    kernel = functools.partial(conv3d_leakyrelu_kernel, negative_slope)

    out_flat = pl.pallas_call(
        kernel,
        out_shape=jax.ShapeDtypeStruct((B, Cout, M), x.dtype),
        grid_spec=pltpu.PrefetchScalarGridSpec(
            num_scalar_prefetch=0,
            grid=(B, m_tiles),
            in_specs=[
                pl.BlockSpec((None, K, tile_m), lambda b, m: (b, 0, m)),
                pl.BlockSpec((Cout, K), lambda b, m: (0, 0)),
                pl.BlockSpec((Cout, 1), lambda b, m: (0, 0)),
            ],
            out_specs=pl.BlockSpec((None, Cout, tile_m), lambda b, m: (b, 0, m)),
        ),
        compiler_params=pltpu.CompilerParams(
            dimension_semantics=("parallel", "parallel")),
    )(patches, w_mat, b_mat)

    # Channels-major output means this is a free reshape (no transpose).
    return out_flat.reshape(B, Cout, D, H, W)


def reference_conv_block(x, weight, bias, negative_slope=0.2):
    """Pure-JAX reference mirroring PyTorch Conv3d(k=3, s=1, p=1) + LeakyReLU(0.2)."""
    out = jax.lax.conv_general_dilated(
        x, weight,
        window_strides=(1, 1, 1),
        padding=((1, 1), (1, 1), (1, 1)),
        dimension_numbers=("NCDHW", "OIDHW", "NCDHW"),
        precision=jax.lax.Precision.HIGHEST,
    )
    out = out + bias.reshape(1, -1, 1, 1, 1)
    return jnp.where(out >= 0, out, negative_slope * out)


if __name__ == "__main__":
    B, CIN, COUT = 2, 4, 8
    D = H = W = 8            # small 3D volume

    key = jax.random.PRNGKey(0)
    kx, kw, kb = jax.random.split(key, 3)
    x = jax.random.normal(kx, (B, CIN, D, H, W), jnp.float32)
    weight = jax.random.normal(kw, (COUT, CIN, 3, 3, 3), jnp.float32) * 0.1
    bias = jax.random.normal(kb, (COUT,), jnp.float32) * 0.1

    out = conv_block_forward(x, weight, bias)
    jax.block_until_ready(out)

    ref = reference_conv_block(x, weight, bias)
    assert out.shape == (B, COUT, D, H, W), f"bad output shape {out.shape}"
    assert jnp.allclose(out, ref, atol=1e-3, rtol=1e-3), "conv_block output mismatch"

    print("KERNEL_OK")
</pallas_src>

<mosaic_0001>
module attributes {stable_mosaic.version = 11 : i64} {
  func.func @conv3d_leakyrelu_kernel(%arg0: i32, %arg1: i32, %arg2: memref<1x108x256xf32, #tpu.memory_space<vmem>>, %arg3: memref<8x108xf32, #tpu.memory_space<vmem>>, %arg4: memref<8x1xf32, #tpu.memory_space<vmem>>, %arg5: memref<1x8x256xf32, #tpu.memory_space<vmem>>) attributes {dimension_semantics = [#tpu.dimension_semantics<parallel>, #tpu.dimension_semantics<parallel>], iteration_bounds = array<i64: 2, 2>, scalar_prefetch = 0 : i64, scratch_operands = 0 : i64, tpu.core_type = #tpu.core_type<tc>, window_params = [{transform_indices = @transform_0, window_bounds = array<i64: 1, 108, 256>}, {pipeline_mode = #tpu.pipeline_mode<synchronous>, transform_indices = @transform_1, window_bounds = array<i64: 8, 108>}, {pipeline_mode = #tpu.pipeline_mode<synchronous>, transform_indices = @transform_2, window_bounds = array<i64: 8, 1>}, {transform_indices = @transform_3, window_bounds = array<i64: 1, 8, 256>}]} {
    %c0 = arith.constant 0 : index
    %c0_0 = arith.constant 0 : index
    %0 = vector.load %arg3[%c0, %c0_0] : memref<8x108xf32, #tpu.memory_space<vmem>>, vector<8x108xf32>
    %c0_1 = arith.constant 0 : index
    %c0_2 = arith.constant 0 : index
    %c0_3 = arith.constant 0 : index
    %1 = vector.load %arg2[%c0_1, %c0_2, %c0_3] : memref<1x108x256xf32, #tpu.memory_space<vmem>>, vector<1x108x256xf32>
    %2 = vector.shape_cast %1 : vector<1x108x256xf32> to vector<108x256xf32>
    %cst = arith.constant dense<0.000000e+00> : vector<8x256xf32>
    %3 = tpu.matmul %0, %2, %cst {dimension_numbers = #tpu.dot_dimension_numbers<[1], [0], [0], [1], [0, 0, 1, 1], [], []>} : vector<8x108xf32>, vector<108x256xf32>, vector<8x256xf32> -> vector<8x256xf32>
    %c0_4 = arith.constant 0 : index
    %c0_5 = arith.constant 0 : index
    %4 = vector.load %arg4[%c0_4, %c0_5] : memref<8x1xf32, #tpu.memory_space<vmem>>, vector<8x1xf32>
    %5 = vector.broadcast %4 : vector<8x1xf32> to vector<8x256xf32>
    %6 = arith.addf %3, %5 : vector<8x256xf32>
    %cst_6 = arith.constant 0.000000e+00 : f32
    %7 = vector.broadcast %cst_6 : f32 to vector<8x256xf32>
    %8 = arith.cmpf oge, %6, %7 : vector<8x256xf32>
    %cst_7 = arith.constant 2.000000e-01 : f32
    %9 = vector.broadcast %cst_7 : f32 to vector<8x256xf32>
    %10 = arith.mulf %9, %6 : vector<8x256xf32>
    %11 = arith.select %8, %6, %10 : vector<8x256xi1>, vector<8x256xf32>
    %c0_8 = arith.constant 0 : index
    %c0_9 = arith.constant 0 : index
    %c0_10 = arith.constant 0 : index
    %12 = vector.load %arg5[%c0_8, %c0_9, %c0_10] : memref<1x8x256xf32, #tpu.memory_space<vmem>>, vector<1x8x256xf32>
    %13 = vector.shape_cast %12 : vector<1x8x256xf32> to vector<8x256xf32>
    %14 = vector.shape_cast %11 : vector<8x256xf32> to vector<1x8x256xf32>
    tpu.vector_store %arg5[%c0_8, %c0_9, %c0_10], %14 {strides = array<i32>} : memref<1x8x256xf32, #tpu.memory_space<vmem>>, vector<1x8x256xf32>,
    return
  }
  func.func @transform_0(%arg0: i32, %arg1: i32) -> (i32, i32, i32) {
    %c0_i32 = arith.constant 0 : i32
    %c0_i32_0 = arith.constant 0 : i32
    return %arg0, %c0_i32, %arg1 : i32, i32, i32
  }
  func.func @transform_1(%arg0: i32, %arg1: i32) -> (i32, i32) {
    %c0_i32 = arith.constant 0 : i32
    %c0_i32_0 = arith.constant 0 : i32
    %c0_i32_1 = arith.constant 0 : i32
    return %c0_i32, %c0_i32_0 : i32, i32
  }
  func.func @transform_2(%arg0: i32, %arg1: i32) -> (i32, i32) {
    %c0_i32 = arith.constant 0 : i32
    %c0_i32_0 = arith.constant 0 : i32
    %c0_i32_1 = arith.constant 0 : i32
    return %c0_i32, %c0_i32_0 : i32, i32
  }
  func.func @transform_3(%arg0: i32, %arg1: i32) -> (i32, i32, i32) {
    %c0_i32 = arith.constant 0 : i32
    %c0_i32_0 = arith.constant 0 : i32
    return %arg0, %c0_i32, %arg1 : i32, i32, i32
  }
}

</mosaic_0001>

<bundles_post_ra>
// kernel: tpu_custom_call.1
= control target key start
LH: loop header
LB: loop body
LE: loop exit
PB: predicated region body
PF: predicated region fallthrough
CT: control target
= control target key end

     0   :  { %8 = vsyncpa [#allocation4], 0  ;;  %s977_s0 = inlined_call_operand.vmem [shape: f32[2,108,512], index: 0, kind: input, shape index: {}]   ;;  %s978_s1 = inlined_call_operand.vmem [shape: f32[8,108], index: 1, kind: input, shape index: {}]   ;;  %s979_s2 = inlined_call_operand.vmem [shape: f32[8,1], index: 2, kind: input, shape index: {}]   ;;  %s980_s3 = inlined_call_operand.hbm [shape: f32[2,8,512], index: 3, kind: output, shape index: {}]  }
   0x1   :  { %10 = vsyncpa [#allocation4 + $0x1], 0  ;;  %s732_s12 = smov 0   ;;  %s734_s13 = smov 0  }
   0x2   :  { %s736_s14 = smov 0   ;;  %s738_s15 = smov 0  }
   0x3   :  { %s740_s16 = smov 0   ;;  %s742_s17 = smov 0  }
   0x4   :  { %s744_s18 = smov 0   ;;  %s746_s19 = smov 0  }
   0x5 LB: > { %s487_s20 = sadd.s32 4294967295, %s706_s19   ;;  %s488_s21 = sadd.s32 4294967294, %s706_s19   ;;  %s706_s19 = sphi %s746_s19, %s16_s19   ;;  %s702_s18 = sphi %s744_s18, %s990_s18   ;;  %s698_s17 = sphi %s742_s17, %s989_s17   ;;  %s694_s16 = sphi %s740_s16, %s988_s16   ;;  %s690_s15 = sphi %s738_s15, %s987_s15   ;;  %s686_s14 = sphi %s736_s14, %s986_s14   ;;  %s682_s13 = sphi %s734_s13, %s985_s13   ;;  %s678_s12 = sphi %s732_s12, %s984_s12  }
   0x6   : > { %s25_s22 = sadd.s32 1, %s698_s17  ;;  %s28_s23 = sadd.s32 1, %s702_s18 }
   0x7   : > { %p26_p0 = scmp.ge.s32.totalorder %s25_s22, 2  ;;  %p44_p1 = scmp.ne.s32.totalorder %s686_s14, %s682_s13 }
   0x8   : > { %p45_p2 = scmp.eq.s32.totalorder %s706_s19, 0  ;;  %p118_p5 = scmp.eq.s32.totalorder %s487_s20, 3 }
   0x9   : > { %s992_s22 = smov (%p26_p0, %s25_s22), 0  ;;  %s994_s23 = smov (!%p26_p0, %s28_s23), %s702_s18 }
   0xa   : > { %s33_s24 = ssub.s32 %s698_s17, %s992_s22  ;;  %p784_p3 = por %p45_p2, %p44_p1 }
   0xb   : > { %p30_p4 = scmp.ge.s32.totalorder %s994_s23, 2  ;;  %p123_p6 = scmp.ne.s32.totalorder %s682_s13, %s678_s12 }
   0xc   : > { %p124_p7 = scmp.eq.s32.totalorder %s488_s21, 3  ;;  %p792_p8 = por %p118_p5, %p44_p1 }
   0xd   : > { %s996_s23 = smov (%p30_p4, %s994_s23), 0  ;;  %s37_s30 = sadd.s32 1, %s686_s14 }
   0xe   : > { %p796_p9 = por %p124_p7, %p123_p6  ;;  %s32_s28 = ssub.s32 %s702_s18, %s996_s23 }
   0xf   : > { %s34_s29 = sor.u32 %s33_s24, %s32_s28  ;;  %p490_p11 = scmp.ge.s32.totalorder %s706_s19, 4 }
  0x10   : > { %p35_p10 = scmp.eq.s32.totalorder %s34_s29, 0 }
  0x11   : > { %146 = sbr.rel (%p490_p11) target bundleno = 46 (0x2e), region = 24 }
  0x12   : > { %s804_s4 = scalar_select %p35_p10, %s686_s14, %s37_s30  }
  0x18   : > { %149 = sbr.rel (!%p784_p3) target bundleno = 46 (0x2e), region = 28  ;;  %s151_s5 = sand.u32 (%p784_p3), 1, %s686_s14  }
  0x19   : > { %s534_s6 = smul.u32 (%p784_p3), 224, %s151_s5  ;;  %s491_s7 = sshll.u32 (%p784_p3), %s698_s17, 1 }
  0x1a   : > { %s535_s8 = smul.u32 (%p784_p3), 56, %s702_s18 }
  0x1b   : > { %s820_s24 = scalar_lea.vmem (%p784_p3), [#allocation2], %s534_s6 }
  0x1c   : > { %s156_s9 = sadd.s32 (%p784_p3), %s535_s8, %s491_s7 }
  0x1d   : > { %s492_s10 = sshll.u32 (%p784_p3), %s156_s9, 3 }
  0x1e   : > { %s815_s21 = scalar_lea.vmem (%p784_p3), %s977_s0, %s492_s10 }
  0x1f   : > { %v171_v0 = vld [vmem:[%s815_s21] sm:$0xff]  ;;  %v173_v1 = vld [vmem:[%s815_s21 + $0x8] sm:$0xff] }
  0x20   : > { %v175_v2 = vld [vmem:[%s815_s21 + $0x20] sm:$0xff]  ;;  %172 = vst [vmem:[%s820_s24] sm:$0xff] %v171_v0  ;;  %174 = vst [vmem:[%s820_s24 + $0x8] sm:$0xff] %v173_v1  ;;  %v177_v3 = vld [vmem:[%s815_s21 + $0x28] sm:$0xff] }
  0x21   : > { %176 = vst [vmem:[%s820_s24 + $0x10] sm:$0xff] %v175_v2  ;;  %v179_v4 = vld [vmem:[%s815_s21 + $0x40] sm:$0xff]  ;;  %v181_v5 = vld [vmem:[%s815_s21 + $0x48] sm:$0xff]  ;;  %178 = vst [vmem:[%s820_s24 + $0x18] sm:$0xff] %v177_v3 }
  0x22   : > { %180 = vst [vmem:[%s820_s24 + $0x20] sm:$0xff] %v179_v4  ;;  %182 = vst [vmem:[%s820_s24 + $0x28] sm:$0xff] %v181_v5  ;;  %v183_v6 = vld [vmem:[%s815_s21 + $0x60] sm:$0xff]  ;;  %v185_v7 = vld [vmem:[%s815_s21 + $0x68] sm:$0xff] }
  0x23   : > { %v187_v8 = vld [vmem:[%s815_s21 + $0x80] sm:$0xff]  ;;  %184 = vst [vmem:[%s820_s24 + $0x30] sm:$0xff] %v183_v6  ;;  %186 = vst [vmem:[%s820_s24 + $0x38] sm:$0xff] %v185_v7  ;;  %v189_v9 = vld [vmem:[%s815_s21 + $0x88] sm:$0xff] }
  0x24   : > { %188 = vst [vmem:[%s820_s24 + $0x40] sm:$0xff] %v187_v8  ;;  %v191_v10 = vld [vmem:[%s815_s21 + $0xa0] sm:$0xff]  ;;  %v193_v11 = vld [vmem:[%s815_s21 + $0xa8] sm:$0xff]  ;;  %190 = vst [vmem:[%s820_s24 + $0x48] sm:$0xff] %v189_v9 }
  0x25   : > { %192 = vst [vmem:[%s820_s24 + $0x50] sm:$0xff] %v191_v10  ;;  %194 = vst [vmem:[%s820_s24 + $0x58] sm:$0xff] %v193_v11  ;;  %v195_v12 = vld [vmem:[%s815_s21 + $0xc0] sm:$0xff]  ;;  %v197_v13 = vld [vmem:[%s815_s21 + $0xc8] sm:$0xff] }
  0x26   : > { %v199_v14 = vld [vmem:[%s815_s21 + $0xe0] sm:$0xff]  ;;  %196 = vst [vmem:[%s820_s24 + $0x60] sm:$0xff] %v195_v12  ;;  %198 = vst [vmem:[%s820_s24 + $0x68] sm:$0xff] %v197_v13  ;;  %v201_v15 = vld [vmem:[%s815_s21 + $0xe8] sm:$0xff] }
  0x27   : > { %200 = vst [vmem:[%s820_s24 + $0x70] sm:$0xff] %v199_v14  ;;  %v203_v16 = vld [vmem:[%s815_s21 + $0x100] sm:$0xff]  ;;  %v205_v17 = vld [vmem:[%s815_s21 + $0x108] sm:$0xff]  ;;  %202 = vst [vmem:[%s820_s24 + $0x78] sm:$0xff] %v201_v15 }
  0x28   : > { %204 = vst [vmem:[%s820_s24 + $0x80] sm:$0xff] %v203_v16  ;;  %206 = vst [vmem:[%s820_s24 + $0x88] sm:$0xff] %v205_v17  ;;  %v207_v18 = vld [vmem:[%s815_s21 + $0x120] sm:$0xff]  ;;  %v209_v19 = vld [vmem:[%s815_s21 + $0x128] sm:$0xff] }
  0x29   : > { %v211_v20 = vld [vmem:[%s815_s21 + $0x140] sm:$0xff]  ;;  %208 = vst [vmem:[%s820_s24 + $0x90] sm:$0xff] %v207_v18  ;;  %210 = vst [vmem:[%s820_s24 + $0x98] sm:$0xff] %v209_v19  ;;  %v213_v21 = vld [vmem:[%s815_s21 + $0x148] sm:$0xff] }
  0x2a   : > { %212 = vst [vmem:[%s820_s24 + $0xa0] sm:$0xff] %v211_v20  ;;  %v215_v22 = vld [vmem:[%s815_s21 + $0x160] sm:$0xff]  ;;  %v217_v23 = vld [vmem:[%s815_s21 + $0x168] sm:$0xff]  ;;  %214 = vst [vmem:[%s820_s24 + $0xa8] sm:$0xff] %v213_v21 }
  0x2b   : > { %216 = vst [vmem:[%s820_s24 + $0xb0] sm:$0xff] %v215_v22  ;;  %218 = vst [vmem:[%s820_s24 + $0xb8] sm:$0xff] %v217_v23  ;;  %v219_v24 = vld [vmem:[%s815_s21 + $0x180] sm:$0xff]  ;;  %v221_v25 = vld [vmem:[%s815_s21 + $0x188] sm:$0xff] }
  0x2c   : > { %v223_v26 = vld [vmem:[%s815_s21 + $0x1a0] sm:$0xff]  ;;  %220 = vst [vmem:[%s820_s24 + $0xc0] sm:$0xff] %v219_v24  ;;  %222 = vst [vmem:[%s820_s24 + $0xc8] sm:$0xff] %v221_v25  ;;  %v225_v27 = vld [vmem:[%s815_s21 + $0x1a8] sm:$0xff] }
  0x2d   : > { %224 = vst [vmem:[%s820_s24 + $0xd0] sm:$0xff] %v223_v26  ;;  %226 = vst [vmem:[%s820_s24 + $0xd8] sm:$0xff] %v225_v27 }
  0x2e PF: > { %p493_p12 = scmp.ge.s32.totalorder %s706_s19, 1  ;;  %p231_p13 = scmp.lt.s32.totalorder %s706_s19, 5 }
  0x30   : > { %p232_p0 = pnand %p493_p12, %p231_p13 }
  0x31   : > { %s878_s25 = sand.u32 (!%p232_p0), 1, %s682_s13   ;;  %v708_v28 = vmov (!%p232_p0), 0.0   ;;  %v292_v29 = vld [vmem:[%s979_s2] sm:$0xff] (!%p232_p0)  ;;  %v709_v30 = vmov (!%p232_p0), 0   ;;  %vm302_vm0 = vcmask (!%p232_p0), 1043456   ;;  %vm710_vm1 = vmmov (!%p232_p0), 1  }
  0x32   : > { %235 = sbr.rel (%p232_p0) target bundleno = 317 (0x13d), region = 51  ;;  %373 = vmatprep.mubr.f32.mxu0 (!%p232_p0), %v708_v28  ;;  %611 = vset.pattern.permute.xlu0 (!%p232_p0), %v709_v30  ;;  %vm529_vm2 = vmpackc.low (!%p232_p0), %vm302_vm0, %vm710_vm1  ;;  %v263_v9 = vld [vmem:[%s978_s1] sm:$0xff] (!%p232_p0)  ;;  %vm298_vm3 = vcmask (!%p232_p0), 883712   ;;  %s494_s8 = sshll.u32 (!%p232_p0), %s878_s25, 4 }
  0x33   : > { %s536_s28 = smul.u32 (!%p232_p0), 224, %s878_s25  ;;  %295 = vperm.xlu0 (!%p232_p0), %611, %v292_v29   ;;  %s499_s9 = sshll.u32 (!%p232_p0), %s690_s15, 1 }
  0x34   : > { %s500_s10 = sshll.u32 (!%p232_p0), %s694_s16, 2  ;;  %s260_s21 = scalar_lea.vmem (!%p232_p0), [#allocation3], %s494_s8 }
  0x35   : > { %s884_s5 = scalar_lea.vmem (!%p232_p0), [#allocation2], %s536_s28  ;;  %s401_s11 = sadd.s32 (!%p232_p0), %s500_s10, %s499_s9 }
  0x36   : > { %v265_v31 = vld [vmem:[%s884_s5 + $0x8] sm:$0xff] (!%p232_p0)  ;;  %v267_v32 = vld [vmem:[%s884_s5 + $0x18] sm:$0xff] (!%p232_p0)  ;;  %v264_v33 = vld [vmem:[%s884_s5] sm:$0xff] (!%p232_p0)  ;;  %s501_s20 = sshll.u32 (!%p232_p0), %s401_s11, 7  ;;  %s405_s24 = sshll.u32 (!%p232_p0), %s260_s21, 4  ;;  %s925_s24 = int_to_ptr.vmem [resolvable:$true] %s405_s24 }
  0x37   : > { %v504_v34 = vpack.c.bf16 (!%p232_p0), %v267_v32, %v265_v31  ;;  %v266_v35 = vld [vmem:[%s884_s5 + $0x10] sm:$0xff] (!%p232_p0)  ;;  %v269_v36 = vld [vmem:[%s884_s5 + $0x28] sm:$0xff] (!%p232_p0)  ;;  %v271_v37 = vld [vmem:[%s884_s5 + $0x38] sm:$0xff] (!%p232_p0)  ;;  %s923_s15 = scalar_lea.hbm (!%p232_p0), %s980_s3, %s501_s20  ;;  %s389_s16 = scalar_lea.sflag (!%p232_p0), [#allocation4], %s878_s25 }
  0x38   : > { %v506_v38 = vpack.c.bf16 (!%p232_p0), %v266_v35, %v264_v33  ;;  %v508_v39 = vpack.c.bf16 (!%p232_p0), %v271_v37, %v269_v36  ;;  %v268_v40 = vld [vmem:[%s884_s5 + $0x20] sm:$0xff] (!%p232_p0)  ;;  %v270_v41 = vld [vmem:[%s884_s5 + $0x30] sm:$0xff] (!%p232_p0)  ;;  %v273_v42 = vld [vmem:[%s884_s5 + $0x48] sm:$0xff] (!%p232_p0)  ;;  %s612_s30 = scalar_lea.vmem (!%p232_p0), %s925_s24, 256 }
  0x39   : > { %505 = vmatprep.subr.bf16.mxu0 %v504_v34  ;;  %v275_v43 = vld [vmem:[%s884_s5 + $0x58] sm:$0xff]  ;;  %v510_v44 = vpack.c.bf16 %v270_v41, %v268_v40  ;;  %v272_v46 = vld [vmem:[%s884_s5 + $0x40] sm:$0xff]  ;;  %v274_v47 = vld [vmem:[%s884_s5 + $0x50] sm:$0xff]  ;;  %p613_p1 = scmp.ne.s32.totalorder %s925_s24, %s612_s30 }
  0x3a   : > { %507 = vmatpush1.bf16.msra.mxu0 %v506_v38  ;;  %v512_v45 = vpack.c.bf16 %v275_v43, %v273_v42  ;;  %v277_v48 = vld [vmem:[%s884_s5 + $0x68] sm:$0xff]  ;;  %v279_v49 = vld [vmem:[%s884_s5 + $0x78] sm:$0xff]  ;;  %v514_v50 = vpack.c.bf16 %v274_v47, %v272_v46  ;;  %v276_v52 = vld [vmem:[%s884_s5 + $0x60] sm:$0xff] }
  0x3b   : > { %509 = vmatprep.subr.bf16.mxu0 %v508_v39  ;;  %v516_v51 = vpack.c.bf16 %v279_v49, %v277_v48  ;;  %v278_v53 = vld [vmem:[%s884_s5 + $0x70] sm:$0xff]  ;;  %v281_v54 = vld [vmem:[%s884_s5 + $0x88] sm:$0xff]  ;;  %v283_v55 = vld [vmem:[%s884_s5 + $0x98] sm:$0xff]  ;;  %p614_p2 = pnand %p613_p1, %p792_p8 }
  0x3c   : > { %v518_v56 = vpack.c.bf16 %v278_v53, %v276_v52  ;;  %v520_v57 = vpack.c.bf16 %v283_v55, %v281_v54  ;;  %v280_v58 = vld [vmem:[%s884_s5 + $0x80] sm:$0xff]  ;;  %v282_v59 = vld [vmem:[%s884_s5 + $0x90] sm:$0xff]  ;;  %v285_v60 = vld [vmem:[%s884_s5 + $0xa8] sm:$0xff] }
  0x3d   : > { %v287_v61 = vld [vmem:[%s884_s5 + $0xb8] sm:$0xff]  ;;  %v522_v62 = vpack.c.bf16 %v282_v59, %v280_v58  ;;  %v284_v0 = vld [vmem:[%s884_s5 + $0xa0] sm:$0xff]  ;;  %v286_v1 = vld [vmem:[%s884_s5 + $0xb0] sm:$0xff]  ;;  %p615_p3 = pneg %p614_p2 }
  0x3e   : > { %511 = vmatpush1.bf16.msra.mxu0 %v510_v44  ;;  %v524_v63 = vpack.c.bf16 %v287_v61, %v285_v60  ;;  %v289_v2 = vld [vmem:[%s884_s5 + $0xc8] sm:$0xff]  ;;  %v291_v3 = vld [vmem:[%s884_s5 + $0xd8] sm:$0xf]  ;;  %v526_v4 = vpack.c.bf16 %v286_v1, %v284_v0  ;;  %v288_v6 = vld [vmem:[%s884_s5 + $0xc0] sm:$0xff] }
  0x3f   : > { %513 = vmatprep.subr.bf16.mxu0 %v512_v45  ;;  %v528_v5 = vpack.c.bf16 %v291_v3, %v289_v2  ;;  %v290_v7 = vld [vmem:[%s884_s5 + $0xd0] sm:$0xf]  ;;  %s711_s5 = smov [#allocation3]  }
  0x40   : > { %v531_v8 = vpack.c.bf16 %v290_v7, %v288_v6  ;;  %s616_s6 = sshll.u32 %s711_s5, 4  ;;  %s617_s6 = int_to_ptr.vmem [resolvable:$false] %s616_s6 }
  0x41   : > { %s618_s7 = scalar_lea.vmem %s617_s6, 512  ;;  %p619_p4 = scmp.lt.s32.totalorder %s925_s24, %s617_s6 }
  0x42   : > { %515 = vmatpush1.bf16.msra.mxu0 %v514_v50  ;;  %p620_p5 = scmp.lt.s32.totalorder %s618_s7, %s612_s30 }
  0x43   : > { %517 = vmatprep.subr.bf16.mxu0 %v516_v51 }
  0x44   : > { %p621_p6 = por %p620_p5, %p619_p4 }
  0x46   : > { %519 = vmatpush1.bf16.msra.mxu0 %v518_v56  ;;  %p622_p7 = pnand %p621_p6, %p615_p3 }
  0x47   : > { %521 = vmatprep.subr.bf16.mxu0 %v520_v57 }
  0x4a   : > { %523 = vmatpush1.bf16.msra.mxu0 %v522_v62 }
  0x4b   : > { %525 = vmatprep.subr.bf16.mxu0 %v524_v63 }
  0x4e   : > { %527 = vmatpush1.bf16.msra.mxu0 %v526_v4 }
  0x4f   : > { %530 = vmatprep.subr.msk.bf16.mxu0 %vm529_vm2, %v528_v5 }
  0x52   : > { %533 = vmatpush1.bf16.msk.msra.mxu0 %vm529_vm2, %v531_v8 }
  0x55   : > { %497 = vmatmul.mubr.msk.f32.vlgmr.msra.gmra.mrb[0].mxu0 %vm298_vm3, %v263_v9 }
  0xb2   : > { %v296_v10 = vpop.permute.xlu0 %295 }
 0x128   : > { %v375_v11 = vpop.f32.mrb[0].mxu0 }
 0x129   : > { %v376_v12 = vadd.f32 %v375_v11, %v296_v10  ;;  %v377_v13 = vpop.f32.mrb[1].mxu0 }
 0x12a   : > { %v378_v14 = vadd.f32 %v377_v13, %v296_v10 }
 0x12b   : > { %vm380_vm4 = vcmp.ge.f32.partialorder %v376_v12, 0.0  ;;  %v382_v15 = vmul.f32 0.2, %v376_v12 }
 0x12c   : > { %vm381_vm5 = vcmp.ge.f32.partialorder %v378_v14, 0.0  ;;  %v383_v16 = vmul.f32 0.2, %v378_v14 }
 0x12d   : > { %v384_v17 = vsel %vm380_vm4, %v376_v12, %v382_v15 }
 0x12e   : > { %v385_v18 = vsel %vm381_vm5, %v378_v14, %v383_v16  ;;  %386 = vst [vmem:[%s260_s21] sm:$0xff] %v384_v17 }
 0x12f   : > { %387 = vst [vmem:[%s260_s21 + $0x8] sm:$0xff] %v385_v18 }
 0x130   : > { %625 = shalt.err (!%p622_p7)
}
 0x131   : > { %s626_s25 = scalar_lea.hbm %s923_s15, 256  ;;  %s630_s10 = scalar_lea.hbm %s980_s3, 1024 }
 0x132   : > { %p627_p10 = scmp.ne.s32.totalorder %s923_s15, %s626_s25  ;;  %p631_p13 = scmp.lt.u32.totalorder %s923_s15, %s980_s3 }
 0x133   : > { %p632_p0 = scmp.lt.u32.totalorder %s630_s10, %s626_s25  ;;  %p634_p2 = scmp.lt.u32.totalorder %s626_s25, %s923_s15 }
 0x134   : > { %p628_p11 = pnand %p627_p10, %p792_p8 }
 0x135   : > { %p633_p1 = por %p632_p0, %p631_p13 }
 0x136   : > { %p629_p12 = pneg %p628_p11 }
 0x137   : > { %p635_p3 = por %p634_p2, %p633_p1 }
 0x139   : > { %p636_p4 = pnand %p635_p3, %p629_p12 }
 0x13b   : > { %639 = shalt.err (!%p636_p4)
}
 0x13c   : > { %537 = dma.vmem_to_hbm [thread:$0]  (%p792_p8), %s925_s24, 256, %s923_s15, %s389_s16  }
 0x13d PF: > { %p543_p5 = scmp.ge.s32.totalorder %s706_s19, 2  ;;  %s417_s21 = sand.u32 1, %s678_s12  }
 0x13e   : > { %s418_s28 = scalar_lea.sflag [#allocation4], %s417_s21 }
 0x13f   : > { %p540_p6 = pnand %p543_p5, %p796_p9 }
 0x141   : > { %673 = dma.done.wait (!%p540_p6), %s418_s28, 256  }
 0x142   : > { %675 = vsyncadd (!%p540_p6), %s418_s28, 4294967040  ;;  %s16_s19 = sadd.s32 1, %s706_s19   ;;  %s984_s12 = smov %s682_s13 }
 0x143   : > { %p13_p7 = scmp.ge.s32.totalorder %s16_s19, 6   ;;  %s985_s13 = smov %s686_s14 }
 0x144   : > { %s986_s14 = smov %s804_s4  ;;  %s987_s15 = smov %s698_s17 }
 0x145   : > { %s988_s16 = smov %s702_s18  ;;  %s989_s17 = smov %s992_s22 }
 0x146   : > { %s990_s18 = smov %s996_s23  ;;  %15 = sbr.rel (!%p13_p7) target bundleno = 5 (0x5), region = 95 }
 0x14d   :  { %423 = vsyncpa [#allocation4], 1 }
 0x14e   :  { %425 = vsyncpa [#allocation4 + $0x1], 1 }

</bundles_post_ra>
